<compile_context>
chip_gen: v5e
topology: v5e:2x2
jax: 0.10.0
libtpu: 0.0.40
codegen_flags: <defaults>
</compile_context>

<pallas_src>
import math

import jax
import jax.numpy as jnp
from jax.experimental import pallas as pl
from jax.experimental.pallas import tpu as pltpu


# ---------------------------------------------------------------------------
# Primary path: aliased identity (no DMA, no compute).
# ---------------------------------------------------------------------------
def _noop_kernel(x_ref, o_ref):
    # Intentionally empty.  With input_output_aliases={0: 0} the output buffer
    # IS the (already metadata-flattened) input buffer, so there is nothing to
    # move; generating no DMA keeps this at fixed launch overhead.
    del x_ref, o_ref


def _flatten_identity_pallas(x2):
    B, flat = x2.shape
    return pl.pallas_call(
        _noop_kernel,
        out_shape=jax.ShapeDtypeStruct((B, flat), x2.dtype),
        in_specs=[pl.BlockSpec(memory_space=pl.ANY)],
        out_specs=pl.BlockSpec(memory_space=pl.ANY),
        input_output_aliases={0: 0},
    )(x2)


# ---------------------------------------------------------------------------
# Fallback path: HBM-roofline tiled copy with lane-dense blocks.
# ---------------------------------------------------------------------------
def _copy_kernel(x_ref, o_ref):
    o_ref[...] = x_ref[...]


def _flatten_copy_pallas(x2, *, block_bytes=4 * 1024 * 1024):
    B, flat = x2.shape
    dtype = x2.dtype
    itemsize = jnp.dtype(dtype).itemsize
    sub = max(8, 32 // itemsize)          # f32 -> 8, bf16 -> 16, int8/fp8 -> 32
    total = B * flat

    # Canonical lane-dense slab: cols = largest "nice" multiple of 128 that
    # divides the element count, so every store is an unmasked, lane-dense vst
    # regardless of how small B or flat are.
    cols = 0
    for c in (16384, 8192, 4096, 2048, 1024, 512, 256, 128):
        if total % c == 0:
            cols = c
            break

    if cols:
        rows = total // cols
        slab = jnp.reshape(x2, (rows, cols))      # metadata-only
    else:
        rows, cols = B, flat                      # awkward sizes: copy as-is
        slab = x2

    # Rows per block: target ~block_bytes per block (well past the 85%-of-
    # roofline knee), multiple of `sub`, capped at the full row count.
    rows_per_block = max(1, block_bytes // max(1, cols * itemsize))
    if rows_per_block >= rows:
        tb = rows                                  # full dim -> always legal
    else:
        tb = min(rows, max(sub, (rows_per_block // sub) * sub))

    grid = (pl.cdiv(rows, tb),)

    out = pl.pallas_call(
        _copy_kernel,
        out_shape=jax.ShapeDtypeStruct((rows, cols), dtype),
        grid=grid,
        in_specs=[pl.BlockSpec((tb, cols), lambda i: (i, 0))],
        out_specs=pl.BlockSpec((tb, cols), lambda i: (i, 0)),
        compiler_params=pltpu.CompilerParams(
            dimension_semantics=("parallel",),     # lets v7x's 2 TCs split the copy
            vmem_limit_bytes=32 * 1024 * 1024,     # headroom for 4 MiB blocks on v5e/v7x
        ),
    )(slab)
    return jnp.reshape(out, (B, flat))             # metadata-only


# ---------------------------------------------------------------------------
# Public wrapper: PyTorch Flatten.forward equivalent.
# ---------------------------------------------------------------------------
def flatten(x):
    """x.view(x.size(0), -1) — row-major flatten of all trailing dims."""
    B = x.shape[0]
    flat = math.prod(x.shape[1:]) if x.ndim > 1 else 1

    # Metadata-only flatten (same semantics as torch .view on contiguous x).
    x2 = jnp.reshape(x, (B, flat))

    try:
        # Zero-HBM-traffic path: aliased buffer + no-op kernel body.
        return _flatten_identity_pallas(x2)
    except Exception:
        # Robustness fallback: lane-dense roofline copy kernel.
        return _flatten_copy_pallas(x2)


if __name__ == "__main__":
    key = jax.random.PRNGKey(0)
    # Small NCHW input consistent with a conv-style feature map.
    x = jax.random.normal(key, (2, 4, 16, 16), dtype=jnp.float32)

    out = flatten(x)
    out = jax.block_until_ready(out)

    # Correctness check against plain JAX reshape (same semantics as torch .view).
    ref = jnp.reshape(x, (x.shape[0], -1))
    assert out.shape == (2, 4 * 16 * 16), out.shape
    assert out.dtype == x.dtype
    assert jnp.array_equal(out, ref), "mismatch vs reference flatten"

    print("KERNEL_OK")
</pallas_src>

<mosaic_0001>
module attributes {stable_mosaic.version = 11 : i64} {
  func.func @_noop_kernel(%arg0: memref<2x1024xf32, #tpu.memory_space<any>>, %arg1: memref<2x1024xf32, #tpu.memory_space<any>>) attributes {dimension_semantics = [], scalar_prefetch = 0 : i64, scratch_operands = 0 : i64, tpu.core_type = #tpu.core_type<tc>} {
    return
  }
}

module attributes {stable_mosaic.version = 11 : i64} {
  func.func @_copy_kernel(%arg0: i32, %arg1: memref<1x2048xf32, #tpu.memory_space<vmem>>, %arg2: memref<1x2048xf32, #tpu.memory_space<vmem>>) attributes {dimension_semantics = [#tpu.dimension_semantics<parallel>], iteration_bounds = array<i64: 1>, scalar_prefetch = 0 : i64, scratch_operands = 0 : i64, tpu.core_type = #tpu.core_type<tc>, window_params = [{transform_indices = @transform_0, window_bounds = array<i64: 1, 2048>}, {transform_indices = @transform_1, window_bounds = array<i64: 1, 2048>}]} {
    %c0 = arith.constant 0 : index
    %c0_0 = arith.constant 0 : index
    %0 = vector.load %arg1[%c0, %c0_0] : memref<1x2048xf32, #tpu.memory_space<vmem>>, vector<1x2048xf32>
    %c0_1 = arith.constant 0 : index
    %c0_2 = arith.constant 0 : index
    %1 = vector.load %arg2[%c0_1, %c0_2] : memref<1x2048xf32, #tpu.memory_space<vmem>>, vector<1x2048xf32>
    tpu.vector_store %arg2[%c0_1, %c0_2], %0 {strides = array<i32>} : memref<1x2048xf32, #tpu.memory_space<vmem>>, vector<1x2048xf32>,
    return
  }
  func.func @transform_0(%arg0: i32) -> (i32, i32) {
    %c0_i32 = arith.constant 0 : i32
    %c0_i32_0 = arith.constant 0 : i32
    return %arg0, %c0_i32 : i32, i32
  }
  func.func @transform_1(%arg0: i32) -> (i32, i32) {
    %c0_i32 = arith.constant 0 : i32
    %c0_i32_0 = arith.constant 0 : i32
    return %arg0, %c0_i32 : i32, i32
  }
}

</mosaic_0001>

<bundles_post_ra>
// kernel: tpu_custom_call.1
= control target key start
LH: loop header
LB: loop body
LE: loop exit
PB: predicated region body
PF: predicated region fallthrough
CT: control target
= control target key end

     0   :  { %s16_s0 = inlined_call_operand.hbm [shape: f32[2,1024], index: 0, kind: input, shape index: {}, may-alias: {0,1}]   ;;  %s17_s1 = inlined_call_operand.hbm [shape: f32[2,1024], index: 1, kind: output, shape index: {}, may-alias: {0,1}]  }

// kernel: tpu_custom_call.1
= control target key start
LH: loop header
LB: loop body
LE: loop exit
PB: predicated region body
PF: predicated region fallthrough
CT: control target
= control target key end

     0   :  { %6 = vsyncpa [#allocation3], 0  ;;  %s116_s0 = inlined_call_operand.hbm [shape: f32[1,2048], index: 0, kind: input, shape index: {}]   ;;  %s117_s1 = inlined_call_operand.hbm [shape: f32[1,2048], index: 1, kind: output, shape index: {}]  }
   0x1   :  { %7 = vsyncpa [#allocation4], 0  ;;  %s13_s8 = sshll.u32 %s116_s0, 4  ;;  %s98_s9 = smov [#allocation2]   ;;  %s14_s8 = int_to_ptr.hbm [resolvable:$true] %s13_s8 }
   0x2   :  { %s15_s10 = sshll.u32 %s98_s9, 4  ;;  %s16_s10 = int_to_ptr.vmem [resolvable:$true] %s15_s10 }
   0x3   :  { %18 = dma.hbm_to_vmem [thread:$0]  %s14_s8, 256, %s16_s10, [#allocation3]  }
   0x4   :  { %94 = dma.done.wait [#allocation3], 256  }
   0x5   :  { %95 = vsyncadd [#allocation3], 4294967040  ;;  %s99_s11 = smov [#allocation5]   ;;  %s34_s15 = sshll.u32 %s117_s1, 4  ;;  %v23_v0 = vld [vmem:[#allocation2] sm:$0xff]  ;;  %v24_v1 = vld [vmem:[#allocation2 + $0x8] sm:$0xff]  ;;  %s35_s15 = int_to_ptr.hbm [resolvable:$true] %s34_s15 }
   0x6   :  { %s32_s12 = sshll.u32 %s99_s11, 4  ;;  %25 = vst [vmem:[#allocation5] sm:$0xff] %v23_v0  ;;  %s33_s12 = int_to_ptr.vmem [resolvable:$true] %s32_s12 }
   0x7   :  { %26 = vst [vmem:[#allocation5 + $0x8] sm:$0xff] %v24_v1 }
   0x8   :  { %37 = dma.vmem_to_hbm [thread:$0]  %s33_s12, 256, %s35_s15, [#allocation4]  }
   0x9   :  { %96 = dma.done.wait [#allocation4], 256  }
   0xa   :  { %97 = vsyncadd [#allocation4], 4294967040 }
   0xb   :  { %42 = vsyncpa [#allocation3], 1 }
   0xc   :  { %43 = vsyncpa [#allocation4], 1 }

</bundles_post_ra>
